<compile_context>
chip_gen: v6e
topology: v6e:2x2x1
jax: 0.10.0
libtpu: 0.0.40
codegen_flags: <defaults>
</compile_context>

<pallas_src>
import functools

import jax
import jax.numpy as jnp
from jax import lax
from jax.experimental import pallas as pl
from jax.experimental.pallas import tpu as pltpu


def _round_up(x, m):
    return ((x + m - 1) // m) * m


def _cdiv(a, b):
    return (a + b - 1) // b


def _native_dtype(dt):
    dt = jnp.dtype(dt)
    if dt == jnp.dtype(jnp.float32) or dt == jnp.dtype(jnp.bfloat16):
        return dt
    return jnp.dtype(jnp.float32)


def _sublanes(dt):
    # Packed sublane tile height: 8 rows for 4-byte, 16 for 2-byte, 32 for 1-byte.
    return 32 // jnp.dtype(dt).itemsize


def _vmem_capacity_bytes():
    try:
        return int(pltpu.get_tpu_info().vmem_capacity_bytes)
    except Exception:
        return 64 * 1024 * 1024  # conservative fallback: v7x per-TensorCore VMEM


def _plan(b_pad, d_s, d_t, isz_s, isz_t):
    """Choose (nk, tk_s, tk_t, nbuf, vmem_limit) from the per-generation VMEM."""
    cap = (_vmem_capacity_bytes() * 3) // 4           # leave 25% headroom
    gram_bytes = 2 * b_pad * b_pad * 4                # two f32 accumulators
    out_bytes = 2 * 8 * 128 * 4                       # double-buffered output tile
    margin = 2 * 1024 * 1024                          # Mosaic internal scratch
    avail = max(((cap - gram_bytes - out_bytes - margin) * 3) // 4,
                2 * 1024 * 1024)

    def tiles(nk):
        if nk == 1:
            return d_s, d_t
        return (_round_up(_cdiv(d_s, nk), 128), _round_up(_cdiv(d_t, nk), 128))

    def step_bytes(nk, nbuf):
        tk_s, tk_t = tiles(nk)
        return nbuf * b_pad * (tk_s * isz_s + tk_t * isz_t)

    nk = 1
    while step_bytes(nk, 2) > avail:
        tk_s, tk_t = tiles(nk)
        if tk_s <= 128 and tk_t <= 128:
            break
        nk += 1
    tk_s, tk_t = tiles(nk)
    nbuf = 3 if (nk >= 3 and step_bytes(nk, 3) <= avail) else 2
    used = step_bytes(nk, nbuf) + gram_bytes + out_bytes + margin
    vmem_limit = int(min(cap, max(used + 4 * 1024 * 1024, 16 * 1024 * 1024)))
    return nk, tk_s, tk_t, nbuf, vmem_limit


def _gram_diff_loss(g_s, g_t, inv_b2):
    def _row_normalize(g):
        # F.normalize: g / max(||row||, 1e-12)  ==  g * rsqrt(max(||row||^2, 1e-24))
        # (rsqrt runs on the EUP; last-ulp differences vs sqrt+divide expected.)
        sq = jnp.sum(g * g, axis=1, keepdims=True)
        return g * lax.rsqrt(jnp.maximum(sq, jnp.float32(1e-24)))

    diff = _row_normalize(g_t) - _row_normalize(g_s)
    return jnp.sum(diff * diff) * jnp.float32(inv_b2)


# Contract on the feature axis of both operands -> (B_pad, B_pad) Gram.
# NOTE: MXU default precision (bf16 passes for f32 operands); the relaxed
# rtol=1e-4 tolerance vs the HIGHEST-precision reference is intentional.
# TODO(synk): check the Mosaic dump for per-step vxpose of the (B_pad, TK)
#   RHS tile; if present, feed a pre-transposed layout for the small-B side.
_DN = (((1,), (1,)), ((), ()))


def _cc_kernel_single(fs_ref, ft_ref, out_ref, *, inv_b2):
    """nk == 1: whole feature dim in one tile; no accumulator scratch."""
    fs = fs_ref[...]
    ft = ft_ref[...]
    g_s = lax.dot_general(fs, fs, _DN, preferred_element_type=jnp.float32)
    g_t = lax.dot_general(ft, ft, _DN, preferred_element_type=jnp.float32)
    loss = _gram_diff_loss(g_s, g_t, inv_b2)
    out_ref[...] = jnp.full(out_ref.shape, loss, dtype=jnp.float32)


def _cc_kernel_tiled(fs_ref, ft_ref, out_ref, gs_acc, gt_acc, *, inv_b2):
    """grid = (pair, k_tile); f32 Gram accumulation in VMEM scratch."""
    k = pl.program_id(1)

    @pl.when(k == 0)
    def _init():
        gs_acc[...] = jnp.zeros_like(gs_acc)
        gt_acc[...] = jnp.zeros_like(gt_acc)

    fs = fs_ref[...]
    ft = ft_ref[...]
    gs_acc[...] += lax.dot_general(fs, fs, _DN, preferred_element_type=jnp.float32)
    gt_acc[...] += lax.dot_general(ft, ft, _DN, preferred_element_type=jnp.float32)

    @pl.when(k == pl.num_programs(1) - 1)
    def _finalize():
        loss = _gram_diff_loss(gs_acc[...], gt_acc[...], inv_b2)
        out_ref[...] = jnp.full(out_ref.shape, loss, dtype=jnp.float32)


@jax.jit
def _batched_similarity_loss(fs, ft):
    """fs: (P, B, Ds), ft: (P, B, Dt)  ->  (P,) per-pair losses."""
    p, b, d_s = fs.shape
    d_t = ft.shape[2]

    # Keep each operand in its native floating dtype (no cross-promotion).
    fs = fs.astype(_native_dtype(fs.dtype))
    ft = ft.astype(_native_dtype(ft.dtype))
    isz_s = jnp.dtype(fs.dtype).itemsize
    isz_t = jnp.dtype(ft.dtype).itemsize

    b_pad = _round_up(b, max(_sublanes(fs.dtype), _sublanes(ft.dtype)))

    nk, tk_s, tk_t, nbuf, vmem_limit = _plan(b_pad, d_s, d_t, isz_s, isz_t)
    d_pad_s = tk_s * nk if nk > 1 else d_s
    d_pad_t = tk_t * nk if nk > 1 else d_t

    def _maybe_pad(x, pad_b, pad_d):
        if pad_b == 0 and pad_d == 0:
            return x  # aligned: zero extra HBM traffic
        # Zero rows/cols contribute 0 to the Gram, normalize to 0, and the
        # divisor uses the real b^2 -> padding does not bias the loss.
        return jnp.pad(x, ((0, 0), (0, pad_b), (0, pad_d)))

    fs_p = _maybe_pad(fs, b_pad - b, d_pad_s - d_s)
    ft_p = _maybe_pad(ft, b_pad - b, d_pad_t - d_t)

    inv_b2 = 1.0 / float(b * b)

    cost = pl.CostEstimate(
        flops=2 * p * b_pad * b_pad * (d_pad_s + d_pad_t),
        transcendentals=2 * p * b_pad,
        bytes_accessed=fs_p.size * isz_s + ft_p.size * isz_t + p * 8 * 128 * 4,
    )

    if nk == 1:
        kernel = functools.partial(_cc_kernel_single, inv_b2=inv_b2)
        grid_spec = pltpu.PrefetchScalarGridSpec(
            num_scalar_prefetch=0,
            grid=(p,),
            in_specs=[
                pl.BlockSpec((None, b_pad, d_pad_s), lambda pi: (pi, 0, 0)),
                pl.BlockSpec((None, b_pad, d_pad_t), lambda pi: (pi, 0, 0)),
            ],
            out_specs=pl.BlockSpec((None, 8, 128), lambda pi: (pi, 0, 0)),
        )
        dim_sem = ("parallel",)
    else:
        kernel = functools.partial(_cc_kernel_tiled, inv_b2=inv_b2)
        spec_kwargs = {"pipeline_mode": pl.Buffered(3)} if nbuf == 3 else {}
        grid_spec = pltpu.PrefetchScalarGridSpec(
            num_scalar_prefetch=0,
            grid=(p, nk),
            in_specs=[
                pl.BlockSpec((None, b_pad, tk_s), lambda pi, ki: (pi, 0, ki),
                             **spec_kwargs),
                pl.BlockSpec((None, b_pad, tk_t), lambda pi, ki: (pi, 0, ki),
                             **spec_kwargs),
            ],
            out_specs=pl.BlockSpec((None, 8, 128), lambda pi, ki: (pi, 0, 0)),
            scratch_shapes=[
                pltpu.VMEM((b_pad, b_pad), jnp.float32),
                pltpu.VMEM((b_pad, b_pad), jnp.float32),
            ],
        )
        dim_sem = ("parallel", "arbitrary")

    out = pl.pallas_call(
        kernel,
        out_shape=jax.ShapeDtypeStruct((p, 8, 128), jnp.float32),
        grid_spec=grid_spec,
        compiler_params=pltpu.CompilerParams(
            dimension_semantics=dim_sem,
            vmem_limit_bytes=vmem_limit,
        ),
        cost_estimate=cost,
    )(fs_p, ft_p)

    return out[:, 0, 0]


def similarity_loss(f_s, f_t):
    """One (f_s, f_t) pair.  Arbitrary trailing dims; flattened to (B, D)."""
    b = f_s.shape[0]
    losses = _batched_similarity_loss(f_s.reshape(b, -1)[None],
                                      f_t.reshape(b, -1)[None])
    return losses[0]


def cc_loss(g_s, g_t):
    """Forward pass of CC_Loss: mean of per-pair similarity losses.

    Pairs with identical flattened shapes/dtypes are fused into one
    pallas_call (amortizes launch/pipeline warmup; longer parallel pair axis
    for the v7x megacore).
    """
    flat = []
    for f_s, f_t in zip(g_s, g_t):
        b = f_s.shape[0]
        flat.append((f_s.reshape(b, -1), f_t.reshape(b, -1)))

    groups = {}
    for idx, (fs, ft) in enumerate(flat):
        key = (fs.shape, ft.shape, str(fs.dtype), str(ft.dtype))
        groups.setdefault(key, []).append(idx)

    losses = [None] * len(flat)
    for idxs in groups.values():
        if len(idxs) == 1:
            fs_stack = flat[idxs[0]][0][None]   # free expand_dims, no stack copy
            ft_stack = flat[idxs[0]][1][None]
        else:
            fs_stack = jnp.stack([flat[i][0] for i in idxs])  # (P, B, Ds)
            ft_stack = jnp.stack([flat[i][1] for i in idxs])  # (P, B, Dt)
        group_losses = _batched_similarity_loss(fs_stack, ft_stack)
        for j, i in enumerate(idxs):
            losses[i] = group_losses[j]

    # TODO(synk): PyTorch forward does np.average on CPU; the mean here stays
    # on-device (numerically identical).
    return jnp.mean(jnp.stack(losses))


def _reference_similarity_loss(f_s, f_t):
    """Pure-JAX reference for the sanity check."""
    b = f_s.shape[0]
    fs = f_s.reshape(b, -1).astype(jnp.float32)
    ft = f_t.reshape(b, -1).astype(jnp.float32)

    def norm(g):
        n = jnp.sqrt(jnp.sum(g * g, axis=1, keepdims=True))
        return g / jnp.maximum(n, 1e-12)

    gs = norm(jnp.matmul(fs, fs.T, precision=lax.Precision.HIGHEST))
    gt = norm(jnp.matmul(ft, ft.T, precision=lax.Precision.HIGHEST))
    d = gt - gs
    return jnp.sum(d * d) / (b * b)


if __name__ == "__main__":
    key = jax.random.PRNGKey(0)
    k1, k2, k3, k4, k5, k6, k7, k8 = jax.random.split(key, 8)

    # "Layers" of student/teacher features, NCHW-shaped.
    fs1 = jax.random.normal(k1, (2, 4, 16, 16), dtype=jnp.float32)
    ft1 = jax.random.normal(k2, (2, 4, 16, 16), dtype=jnp.float32)
    fs2 = jax.random.normal(k3, (2, 8, 8, 8), dtype=jnp.float32)
    ft2 = jax.random.normal(k4, (2, 8, 8, 8), dtype=jnp.float32)
    # Student/teacher with different channel counts (D_s != D_t) is legal.
    fs3 = jax.random.normal(k5, (2, 6, 8, 8), dtype=jnp.float32)
    ft3 = jax.random.normal(k6, (2, 8, 8, 8), dtype=jnp.float32)
    # Same shape as layer 1 -> fused into one pallas_call with P=2.
    fs4 = jax.random.normal(k7, (2, 4, 16, 16), dtype=jnp.float32)
    ft4 = jax.random.normal(k8, (2, 4, 16, 16), dtype=jnp.float32)

    g_s = [fs1, fs2, fs3, fs4]
    g_t = [ft1, ft2, ft3, ft4]

    loss = jax.block_until_ready(cc_loss(g_s, g_t))

    ref = jnp.mean(jnp.stack([
        _reference_similarity_loss(fs1, ft1),
        _reference_similarity_loss(fs2, ft2),
        _reference_similarity_loss(fs3, ft3),
        _reference_similarity_loss(fs4, ft4),
    ]))
    assert jnp.allclose(loss, ref, rtol=1e-4, atol=1e-6), (loss, ref)

    print("KERNEL_OK")
</pallas_src>

<mosaic_0001>
module attributes {stable_mosaic.version = 11 : i64} {
  func.func @_cc_kernel_single(%arg0: i32, %arg1: memref<1x8x1024xf32, #tpu.memory_space<vmem>>, %arg2: memref<1x8x1024xf32, #tpu.memory_space<vmem>>, %arg3: memref<1x8x128xf32, #tpu.memory_space<vmem>>) attributes {dimension_semantics = [#tpu.dimension_semantics<parallel>], iteration_bounds = array<i64: 2>, scalar_prefetch = 0 : i64, scratch_operands = 0 : i64, tpu.core_type = #tpu.core_type<tc>, window_params = [{transform_indices = @transform_0, window_bounds = array<i64: 1, 8, 1024>}, {transform_indices = @transform_1, window_bounds = array<i64: 1, 8, 1024>}, {transform_indices = @transform_2, window_bounds = array<i64: 1, 8, 128>}]} {
    %c0 = arith.constant 0 : index
    %c0_0 = arith.constant 0 : index
    %c0_1 = arith.constant 0 : index
    %0 = vector.load %arg1[%c0, %c0_0, %c0_1] : memref<1x8x1024xf32, #tpu.memory_space<vmem>>, vector<1x8x1024xf32>
    %1 = vector.shape_cast %0 : vector<1x8x1024xf32> to vector<8x1024xf32>
    %c0_2 = arith.constant 0 : index
    %c0_3 = arith.constant 0 : index
    %c0_4 = arith.constant 0 : index
    %2 = vector.load %arg2[%c0_2, %c0_3, %c0_4] : memref<1x8x1024xf32, #tpu.memory_space<vmem>>, vector<1x8x1024xf32>
    %3 = vector.shape_cast %2 : vector<1x8x1024xf32> to vector<8x1024xf32>
    %cst = arith.constant dense<0.000000e+00> : vector<8x8xf32>
    %4 = tpu.matmul %1, %1, %cst {dimension_numbers = #tpu.dot_dimension_numbers<[1], [1], [0], [0], [0, 0, 1, 0], [], []>} : vector<8x1024xf32>, vector<8x1024xf32>, vector<8x8xf32> -> vector<8x8xf32>
    %cst_5 = arith.constant dense<0.000000e+00> : vector<8x8xf32>
    %5 = tpu.matmul %3, %3, %cst_5 {dimension_numbers = #tpu.dot_dimension_numbers<[1], [1], [0], [0], [0, 0, 1, 0], [], []>} : vector<8x1024xf32>, vector<8x1024xf32>, vector<8x8xf32> -> vector<8x8xf32>
    %6 = arith.mulf %5, %5 : vector<8x8xf32>
    %cst_6 = arith.constant dense<0.000000e+00> : vector<8xf32>
    %7 = vector.multi_reduction <add>, %6, %cst_6 [1] : vector<8x8xf32> to vector<8xf32>
    %8 = vector.shape_cast %7 : vector<8xf32> to vector<8x1xf32>
    %cst_7 = arith.constant 1.000000e-24 : f32
    %9 = vector.broadcast %cst_7 : f32 to vector<8x1xf32>
    %10 = arith.maximumf %8, %9 : vector<8x1xf32>
    %11 = math.rsqrt %10 : vector<8x1xf32>
    %12 = vector.broadcast %11 : vector<8x1xf32> to vector<8x8xf32>
    %13 = arith.mulf %5, %12 : vector<8x8xf32>
    %14 = arith.mulf %4, %4 : vector<8x8xf32>
    %cst_8 = arith.constant dense<0.000000e+00> : vector<8xf32>
    %15 = vector.multi_reduction <add>, %14, %cst_8 [1] : vector<8x8xf32> to vector<8xf32>
    %16 = vector.shape_cast %15 : vector<8xf32> to vector<8x1xf32>
    %cst_9 = arith.constant 1.000000e-24 : f32
    %17 = vector.broadcast %cst_9 : f32 to vector<8x1xf32>
    %18 = arith.maximumf %16, %17 : vector<8x1xf32>
    %19 = math.rsqrt %18 : vector<8x1xf32>
    %20 = vector.broadcast %19 : vector<8x1xf32> to vector<8x8xf32>
    %21 = arith.mulf %4, %20 : vector<8x8xf32>
    %22 = arith.subf %13, %21 : vector<8x8xf32>
    %23 = arith.mulf %22, %22 : vector<8x8xf32>
    %24 = vector.shape_cast %23 : vector<8x8xf32> to vector<1x8x8xf32>
    %cst_10 = arith.constant dense<0.000000e+00> : vector<1xf32>
    %25 = vector.multi_reduction <add>, %24, %cst_10 [1, 2] : vector<1x8x8xf32> to vector<1xf32>
    %26 = vector.shape_cast %25 : vector<1xf32> to vector<1x1x1xf32>
    %27 = vector.extract %26[0, 0, 0] : f32 from vector<1x1x1xf32>
    %cst_11 = arith.constant 2.500000e-01 : f32
    %28 = arith.mulf %27, %cst_11 : f32
    %29 = vector.broadcast %28 : f32 to vector<8x128xf32>
    %c0_12 = arith.constant 0 : index
    %c0_13 = arith.constant 0 : index
    %c0_14 = arith.constant 0 : index
    %30 = vector.load %arg3[%c0_12, %c0_13, %c0_14] : memref<1x8x128xf32, #tpu.memory_space<vmem>>, vector<1x8x128xf32>
    %31 = vector.shape_cast %30 : vector<1x8x128xf32> to vector<8x128xf32>
    %32 = vector.shape_cast %29 : vector<8x128xf32> to vector<1x8x128xf32>
    tpu.vector_store %arg3[%c0_12, %c0_13, %c0_14], %32 {strides = array<i32>} : memref<1x8x128xf32, #tpu.memory_space<vmem>>, vector<1x8x128xf32>,
    return
  }
  func.func @transform_0(%arg0: i32) -> (i32, i32, i32) {
    %c0_i32 = arith.constant 0 : i32
    %c0_i32_0 = arith.constant 0 : i32
    %c0_i32_1 = arith.constant 0 : i32
    return %arg0, %c0_i32, %c0_i32_0 : i32, i32, i32
  }
  func.func @transform_1(%arg0: i32) -> (i32, i32, i32) {
    %c0_i32 = arith.constant 0 : i32
    %c0_i32_0 = arith.constant 0 : i32
    %c0_i32_1 = arith.constant 0 : i32
    return %arg0, %c0_i32, %c0_i32_0 : i32, i32, i32
  }
  func.func @transform_2(%arg0: i32) -> (i32, i32, i32) {
    %c0_i32 = arith.constant 0 : i32
    %c0_i32_0 = arith.constant 0 : i32
    %c0_i32_1 = arith.constant 0 : i32
    return %arg0, %c0_i32, %c0_i32_0 : i32, i32, i32
  }
}

</mosaic_0001>

<bundles_post_ra>
// kernel: _batched_similarity_loss.1
= control target key start
LH: loop header
LB: loop body
LE: loop exit
PB: predicated region body
PF: predicated region fallthrough
CT: control target
= control target key end

     0   :  { %s884_s9 = smov 0   ;;  %s911_s0 = inlined_call_operand.vmem [shape: f32[2,8,1024], index: 0, kind: input, shape index: {}]   ;;  %s912_s1 = inlined_call_operand.vmem [shape: f32[2,8,1024], index: 1, kind: input, shape index: {}]   ;;  %s913_s2 = inlined_call_operand.vmem [shape: f32[2,8,128], index: 2, kind: output, shape index: {}]  }
   0x1 LB: > { %s833_s10 = sadd.s32 4294967295, %s867_s9   ;;  %p837_p0 = scmp.ge.s32.totalorder %s867_s9, 1  ;;  %s867_s9 = sphi %s884_s9, %s12_s9  }
   0x2   : > { %p122_p1 = scmp.lt.s32.totalorder %s867_s9, 3 }
   0x4   : > { %p123_p2 = pnand %p837_p0, %p122_p1 }
   0x5   : > { %p148_p3 = scmp.lt.s32.totalorder (!%p123_p2), %s833_s10, 1 }
   0x6   : > { %126 = sbr.rel (%p123_p2) target bundleno = 600 (0x258), region = 28 }
   0xb   : > { %s915_s10 = smov (!%p148_p3, %s833_s10), 1  ;;  %vm739_vm0 = vcmask 64512  }
   0xc   : > { %s845_s11 = sshll.u32 %s915_s10, 6  ;;  %s842_s18 = sshll.u32 %s915_s10, 3 }
   0xd   : > { %s152_s14 = scalar_lea.vmem %s911_s0, %s845_s11  ;;  %s157_s17 = scalar_lea.vmem %s912_s1, %s845_s11 }
   0xe   : > { %v163_v0 = vld [vmem:[%s152_s14 + $0x8] sm:$0xff]  ;;  %v162_v1 = vld [vmem:[%s152_s14] sm:$0xff]  ;;  %v165_v2 = vld [vmem:[%s152_s14 + $0x18] sm:$0xff]  ;;  %s161_s22 = scalar_lea.vmem %s913_s2, %s842_s18 }
   0xf   : > { %208 = vmatprep.subr.mxu0 %v163_v0  ;;  %278 = vmatprep.subr.mxu1 %v165_v2  ;;  %v164_v3 = vld [vmem:[%s152_s14 + $0x10] sm:$0xff]  ;;  %v167_v4 = vld [vmem:[%s152_s14 + $0x28] sm:$0xff]  ;;  %v169_v5 = vld [vmem:[%s152_s14 + $0x38] sm:$0xff] }
  0x10   : > { %209 = vmatpush1.xpose.msra.mxu0 %v162_v1  ;;  %279 = vmatpush1.xpose.msra.mxu1 %v164_v3  ;;  %v166_v6 = vld [vmem:[%s152_s14 + $0x20] sm:$0xff]  ;;  %v168_v7 = vld [vmem:[%s152_s14 + $0x30] sm:$0xff]  ;;  %v171_v8 = vld [vmem:[%s157_s17 + $0x8] sm:$0xff] }
  0x11   : > { %242 = vmatprep.mubr.f32.mxu0 %v163_v0  ;;  %312 = vmatprep.mubr.f32.mxu1 %v165_v2  ;;  %v173_v9 = vld [vmem:[%s157_s17 + $0x18] sm:$0xff]  ;;  %v170_v10 = vld [vmem:[%s157_s17] sm:$0xff]  ;;  %v172_v11 = vld [vmem:[%s157_s17 + $0x10] sm:$0xff] }
  0x12   : > { %348 = vmatprep.subr.mxu0 %v167_v4  ;;  %418 = vmatprep.subr.mxu1 %v169_v5  ;;  %v175_v12 = vld [vmem:[%s157_s17 + $0x28] sm:$0xff]  ;;  %v177_v13 = vld [vmem:[%s157_s17 + $0x38] sm:$0xff]  ;;  %v174_v14 = vld [vmem:[%s157_s17 + $0x20] sm:$0xff] }
  0x13   : > { %243 = vmatmul.mubr.f32.vlgmr.msra.gmra.mxu0 %v162_v1  ;;  %313 = vmatmul.mubr.f32.vlgmr.msra.gmra.mxu1 %v164_v3  ;;  %v176_v15 = vld [vmem:[%s157_s17 + $0x30] sm:$0xff] }
  0x14   : > { %349 = vmatpush1.xpose.msra.mxu0 %v166_v6  ;;  %419 = vmatpush1.xpose.msra.mxu1 %v168_v7 }
  0x15   : > { %382 = vmatprep.mubr.f32.mxu0 %v167_v4  ;;  %452 = vmatprep.mubr.f32.mxu1 %v169_v5 }
  0x16   : > { %488 = vmatprep.subr.mxu0 %v171_v8  ;;  %558 = vmatprep.subr.mxu1 %v173_v9 }
  0x17   : > { %383 = vmatmul.mubr.f32.vlgmr.msra.gmra.mxu0 %v166_v6  ;;  %453 = vmatmul.mubr.f32.vlgmr.msra.gmra.mxu1 %v168_v7 }
  0x18   : > { %489 = vmatpush1.xpose.msra.mxu0 %v170_v10  ;;  %559 = vmatpush1.xpose.msra.mxu1 %v172_v11 }
  0x19   : > { %522 = vmatprep.mubr.f32.mxu0 %v171_v8  ;;  %592 = vmatprep.mubr.f32.mxu1 %v173_v9 }
  0x1a   : > { %628 = vmatprep.subr.mxu0 %v175_v12  ;;  %698 = vmatprep.subr.mxu1 %v177_v13 }
  0x1b   : > { %523 = vmatmul.mubr.f32.vlgmr.msra.gmra.mxu0 %v170_v10  ;;  %593 = vmatmul.mubr.f32.vlgmr.msra.gmra.mxu1 %v172_v11 }
  0x1c   : > { %629 = vmatpush1.xpose.msra.mxu0 %v174_v14  ;;  %699 = vmatpush1.xpose.msra.mxu1 %v176_v15 }
  0x1d   : > { %662 = vmatprep.mubr.f32.mxu0 %v175_v12  ;;  %732 = vmatprep.mubr.f32.mxu1 %v177_v13 }
  0x1f   : > { %663 = vmatmul.mubr.f32.vlgmr.msra.gmra.mxu0 %v174_v14  ;;  %733 = vmatmul.mubr.f32.vlgmr.msra.gmra.mxu1 %v176_v15 }
  0xd3   : > { %v244_v16 = vpop.f32.mrf.mxu0  ;;  %v314_v17 = vpop.f32.mrf.mxu1 }
  0xd4   : > { %v315_v26 = vadd.f32 %v314_v17, %v244_v16 }
  0xd5   : > { %v246_v18 = vpop.f32.mrf.mxu0  ;;  %v316_v19 = vpop.f32.mrf.mxu1 }
  0xd7   : > { %v384_v20 = vpop.f32.mrf.mxu0  ;;  %v454_v21 = vpop.f32.mrf.mxu1 }
  0xd8   : > { %v385_v29 = vadd.f32 %v384_v20, %v315_v26 }
  0xd9   : > { %v386_v22 = vpop.f32.mrf.mxu0  ;;  %v456_v23 = vpop.f32.mrf.mxu1 }
  0xda   : > { %v455_v36 = vadd.f32 %v454_v21, %v385_v29 }
  0xdb   : > { %v524_v24 = vpop.f32.mrf.mxu0  ;;  %v594_v25 = vpop.f32.mrf.mxu1 }
  0xdc   : > { %v595_v30 = vadd.f32 %v594_v25, %v524_v24  ;;  %v746_v40 = vmul.f32 %v455_v36, %v455_v36 }
  0xdd   : > { %v526_v27 = vpop.f32.mrf.mxu0  ;;  %v596_v28 = vpop.f32.mrf.mxu1 }
  0xde   : > { %v747_v41 = vsel %vm739_vm0, %v746_v40, 0.0 }
  0xdf   : > { %v664_v31 = vpop.f32.mrf.mxu0  ;;  %v734_v32 = vpop.f32.mrf.mxu1 }
  0xe0   : > { %v665_v33 = vadd.f32 %v664_v31, %v595_v30 }
  0xe1   : > { %v666_v34 = vpop.f32.mrf.mxu0  ;;  %v736_v35 = vpop.f32.mrf.mxu1 }
  0xe2   : > { %v735_v37 = vadd.f32 %v734_v32, %v665_v33 }
  0xe4   : > { %v738_v38 = vmul.f32 %v735_v37, %v735_v37 }
  0xe6   : > { %v740_v39 = vsel %vm739_vm0, %v738_v38, 0.0 }
  0xe7   : > { %741 = vadd.xlane.f32.xlu0 %v740_v39 }
  0xeb   : > { %748 = vadd.xlane.f32.xlu0 %v747_v41 }
 0x170   : > { %v742_v42 = vpop.xlane.xlu0 %741 }
 0x171   : > { %v743_v43 = vmax.f32 %v742_v42, 1e-24 }
 0x173   : > { %857 = vrsqrt.f32 %v743_v43 }
 0x174   : > { %v749_v44 = vpop.xlane.xlu0 %748 }
 0x175   : > { %v750_v45 = vmax.f32 %v749_v44, 1e-24 }
 0x177   : > { %859 = vrsqrt.f32 %v750_v45 }
 0x180   : > { %v858_v46 = vpop.eup %857 }
 0x181   : > { %v745_v48 = vmul.f32 %v858_v46, %v735_v37 }
 0x184   : > { %v860_v47 = vpop.eup %859 }
 0x185   : > { %v752_v49 = vmul.f32 %v860_v47, %v455_v36 }
 0x187   : > { %v753_v50 = vsub.f32 %v745_v48, %v752_v49 }
 0x189   : > { %v754_v51 = vmul.f32 %v753_v50, %v753_v50 }
 0x18b   : > { %v755_v52 = vsel %vm739_vm0, %v754_v51, 0.0 }
 0x18c   : > { %756 = vadd.xlane.f32.xlu1 %v755_v52 }
 0x215   : > { %v757_v53 = vpop.xlane.xlu1 %756 }
 0x216   : > { %v758_v54 = vrot.slane %v757_v53, 4 }
 0x218   : > { %v759_v55 = vadd.f32 %v758_v54, %v757_v53 }
 0x21a   : > { %v760_v56 = vrot.slane %v759_v55, 2 }
 0x21c   : > { %v761_v57 = vadd.f32 %v760_v56, %v759_v55 }
 0x21e   : > { %v762_v58 = vrot.slane %v761_v57, 1 }
 0x220   : > { %v763_v59 = vadd.f32 %v762_v58, %v761_v57 }
 0x222   : > { %847 = vpush %v763_v59 }
 0x253   : > { %s848_s19 = spop %847 }
 0x254   : > { %s765_s23 = smul.f32 0.25, %s848_s19 }
 0x256   : > { %v766_v60 = vstv %s765_s23 }
 0x257   : > { %767 = vst [vmem:[%s161_s22] sm:$0xff] %v766_v60 }
 0x258 PF: > { %s12_s9 = sadd.s32 1, %s867_s9  }
 0x259   : > { %p9_p4 = scmp.ge.s32.totalorder %s12_s9, 4  }
 0x25b   :  { %11 = sbr.rel (!%p9_p4) target bundleno = 1 (0x1), region = 61 }

</bundles_post_ra>
